<compile_context>
chip_gen: v6e
topology: v6e:2x2x1
jax: 0.10.0
libtpu: 0.0.40
codegen_flags: <defaults>
</compile_context>

<pallas_src>
from collections import defaultdict

import jax
import jax.numpy as jnp
from jax.experimental import pallas as pl
from jax.experimental.pallas import tpu as pltpu

_LANE = 128


def _round_up(v: int, m: int) -> int:
    return ((v + m - 1) // m) * m


def _num_tensorcores() -> int:
    """Best-effort TensorCore count per chip (v7x: 2, v5e/v6e: 1)."""
    try:
        kind = jax.devices()[0].device_kind.lower()
    except Exception:
        return 1
    return 2 if "7" in kind else 1


def _physical_vmem_bytes() -> int:
    try:
        return int(pltpu.get_tpu_info().vmem_capacity_bytes)
    except Exception:
        return 64 << 20  # v7x worst case


def _make_ineq_kernel(op_str: str):
    """Fused (weighted column-sum + bias + soft-inequality activation) kernel.

    xt_ref  : (V, TN) VMEM tile of the variables-major data (samples on the lane axis).
    coef_ref: (V, 1)  VMEM coefficient column (same block every step -> DMA'd once).
    p_ref   : (4,)    SMEM scalars [b, B^2, 0.5/B^2, eps] (scalar algebra hoisted).
    o_ref   : (1, TN) VMEM output tile (lane-dense, unmasked stores).
    """

    def kernel(xt_ref, coef_ref, p_ref, o_ref):
        b = p_ref[0]
        B2 = p_ref[1]
        inv_2B2 = p_ref[2]
        eps = p_ref[3]

        xt = xt_ref[...].astype(jnp.float32)          # single dense load (+ bf16 upcast)
        coef = coef_ref[...]                          # (V, 1) f32

        # d = sum_v c_v * x[v, :]  -- broadcast multiply + sublane reduction (VPU+XLU),
        # no per-row value slices, no MXU, no weight matrix in HBM.
        d = jnp.sum(xt * coef, axis=0, keepdims=True) - b    # (1, TN)

        if op_str == "=":
            # gaussian(d, B) = exp(-0.5 * (d / B)^2) = exp(-(d*d) * (0.5 / B^2))
            act = jnp.exp(-(d * d) * inv_2B2)
        elif op_str in (">=", "<="):
            # pbqu(d, B, 0) = B^2 / (d^2 + B^2)
            act = B2 * pl.reciprocal(d * d + B2, approx=True)
        else:  # '>', '<'
            # pbqu(d, B, eps) = B^2 / ((d - eps)^2 + B^2)
            de = d - eps
            act = B2 * pl.reciprocal(de * de + B2, approx=True)

        o_ref[...] = act.astype(o_ref.dtype)

    return kernel


class IneqConstraint:
    """JAX/Pallas port of gcln_model.deepinv.IneqConstraint (forward only)."""

    def __init__(self, coeffs, var_names, op_str):
        c = defaultdict(lambda: 0.0, coeffs)
        self._coeff = tuple(float(c[v]) for v in var_names)
        # torch-layout weight kept for reference / inspection; the kernel consumes the
        # (V, 1) column below.
        self.weight = jnp.asarray(self._coeff, dtype=jnp.float32).reshape(1, -1)
        self._coef_col = jnp.asarray(self._coeff, dtype=jnp.float32).reshape(-1, 1)
        self.b = jnp.asarray([0.0], dtype=jnp.float32)
        self.B = jnp.asarray([0.5], dtype=jnp.float32)    # smoothing width (c1-like)
        self.eps = jnp.asarray([0.5], dtype=jnp.float32)
        self.op_str = op_str

    # ------------------------------------------------------------------ hot path
    def forward_vmajor(self, xt, *, max_block_cols=None):
        """Preferred entry point: xt is variables-major, shape (V, N).

        No wrapper-side transpose, pad, or output copy - the pallas_call streams the
        slab exactly once.  f32 and bf16 inputs are accepted (bf16 halves HBM traffic;
        accumulation is in f32 inside the kernel).
        """
        xt = jnp.asarray(xt)
        if xt.dtype != jnp.bfloat16:
            xt = xt.astype(jnp.float32)
        V, N = xt.shape
        assert V == len(self._coeff)
        itemsize = jnp.dtype(xt.dtype).itemsize

        # --- clamps from the reference forward (mirrored back, like torch clamp_),
        #     plus hoisted scalar algebra delivered via SMEM.
        B_c = jnp.maximum(self.B, 0.1)
        eps_c = jnp.maximum(self.eps, 0.5)
        self.B, self.eps = B_c, eps_c
        B2 = B_c * B_c
        inv_2B2 = 0.5 / B2
        params = jnp.concatenate([self.b, B2, inv_2B2, eps_c]).astype(jnp.float32)  # (4,)

        # --- tile selection: ~4 MiB of x per buffer amortizes the ~0.35 us step
        #     overhead on every generation and stays tiny even double-buffered.
        target_tile_bytes = 4 << 20
        tn = max(_LANE, (target_tile_bytes // (V * itemsize)) // _LANE * _LANE)
        tn = min(tn, _round_up(N, _LANE))
        if max_block_cols is not None:
            tn = min(tn, max(_LANE, (int(max_block_cols) // _LANE) * _LANE))

        # Only split a single-step slab on multi-TensorCore chips (v7x), and then into
        # >= 2 steps per core so both cores get work and still double-buffer.
        num_tc = _num_tensorcores()
        if num_tc > 1:
            min_steps = 2 * num_tc
            if pl.cdiv(N, tn) < min_steps:
                tn = max(_LANE, min(tn, _round_up(pl.cdiv(N, min_steps), _LANE)))

        grid = (pl.cdiv(N, tn),)   # partial boundary block handled by Pallas (no pad)

        # --- explicit VMEM budget + cost hint for the surrounding scheduler.
        in_tile = V * tn * itemsize
        out_tile = tn * 4
        vmem_needed = 2 * in_tile + 2 * out_tile + V * _LANE * 4 + (2 << 20)
        vmem_limit = int(min(_physical_vmem_bytes() // 2, max(32 << 20, 2 * vmem_needed)))

        cost = pl.CostEstimate(
            flops=int(N * (2 * V + 8)),
            transcendentals=int(N),
            bytes_accessed=int(N * V * itemsize + N * 4 + V * 4 + 16),
        )

        out = pl.pallas_call(
            _make_ineq_kernel(self.op_str),
            out_shape=jax.ShapeDtypeStruct((1, N), jnp.float32),
            grid_spec=pltpu.PrefetchScalarGridSpec(
                num_scalar_prefetch=0,
                grid=grid,
                in_specs=[
                    pl.BlockSpec((V, tn), lambda i: (0, i)),              # data tile
                    pl.BlockSpec((V, 1), lambda i: (0, 0)),               # coeff column
                    pl.BlockSpec(memory_space=pltpu.MemorySpace.SMEM),    # scalars
                ],
                out_specs=pl.BlockSpec((1, tn), lambda i: (0, i)),        # lane-dense out
            ),
            compiler_params=pltpu.CompilerParams(
                dimension_semantics=("parallel",),
                vmem_limit_bytes=vmem_limit,
            ),
            cost_estimate=cost,
        )(xt, self._coef_col, params)

        # torch `.squeeze()` on the (N, 1) linear output -> (N,); this squeeze is free.
        return out[0]

    # ------------------------------------------------------- drop-in (N, V) parity
    def __call__(self, x, xn=None, **kw):
        # Drop-in layout like the torch module: x is (N, V).  This path pays one XLA
        # transpose; callers on the hot path should provide variables-major data and use
        # forward_vmajor directly (per review: "accept x in (V, N) layout").
        x = jnp.asarray(x)
        return self.forward_vmajor(x.T, **kw)


def _ref_forward(model, x):
    """Pure-JAX reference of the same math (for correctness checks); x is (N, V) f32."""
    d = (x @ model.weight.T)[:, 0] - model.b[0]
    B = jnp.maximum(model.B, 0.1)[0]
    eps = jnp.maximum(model.eps, 0.5)[0]
    if model.op_str == "=":
        return jnp.exp(-0.5 * (d / B) ** 2)
    if model.op_str in (">=", "<="):
        return (B * B) / (d * d + B * B)
    de = d - eps
    return (B * B) / (de * de + B * B)


if __name__ == "__main__":
    key = jax.random.PRNGKey(0)
    k1, k2, k3 = jax.random.split(key, 3)

    V = 8
    var_names = [f"v{i}" for i in range(V)]
    coeffs = {"v0": 1.0, "v2": -2.0, "v5": 3.0}  # sparse integer-ish coefficients

    # Case 1: '>=' constraint via the drop-in (N, V) path, lane-aligned N.
    N1 = 256
    m1 = IneqConstraint(coeffs, var_names, ">=")
    x1 = jax.random.normal(k1, (N1, V), dtype=jnp.float32)
    act1 = jax.block_until_ready(m1(x1))
    ref1 = _ref_forward(m1, x1)
    assert act1.shape == (N1,)
    assert jnp.allclose(act1, ref1, atol=2e-3, rtol=2e-3)

    # Case 2: '=' (gaussian) via the transpose-free variables-major path, awkward N and a
    # small block cap to exercise the multi-step grid + partial boundary block.
    N2 = 300
    m2 = IneqConstraint(coeffs, var_names, "=")
    x2 = jax.random.normal(k2, (N2, V), dtype=jnp.float32)
    act2 = jax.block_until_ready(m2.forward_vmajor(x2.T, max_block_cols=256))
    ref2 = _ref_forward(m2, x2)
    assert act2.shape == (N2,)
    assert jnp.allclose(act2, ref2, atol=2e-3, rtol=2e-3)

    # Case 3: '>' constraint on a bf16 slab (halved HBM traffic; f32 accumulation inside).
    N3 = 192
    m3 = IneqConstraint(coeffs, var_names, ">")
    x3 = jax.random.normal(k3, (N3, V), dtype=jnp.float32).astype(jnp.bfloat16)
    act3 = jax.block_until_ready(m3.forward_vmajor(x3.T))
    ref3 = _ref_forward(m3, x3.astype(jnp.float32))
    assert act3.shape == (N3,)
    assert jnp.allclose(act3, ref3, atol=2e-3, rtol=2e-3)

    print("KERNEL_OK")
</pallas_src>

<mosaic_0001>
module attributes {stable_mosaic.version = 11 : i64} {
  func.func @kernel(%arg0: i32, %arg1: memref<8x256xf32, #tpu.memory_space<vmem>>, %arg2: memref<8x1xf32, #tpu.memory_space<vmem>>, %arg3: memref<4xf32, #tpu.memory_space<smem>>, %arg4: memref<1x256xf32, #tpu.memory_space<vmem>>) attributes {dimension_semantics = [#tpu.dimension_semantics<parallel>], iteration_bounds = array<i64: 1>, scalar_prefetch = 0 : i64, scratch_operands = 0 : i64, tpu.core_type = #tpu.core_type<tc>, window_params = [{transform_indices = @transform_0, window_bounds = array<i64: 8, 256>}, {pipeline_mode = #tpu.pipeline_mode<synchronous>, transform_indices = @transform_1, window_bounds = array<i64: 8, 1>}, {transform_indices = @transform_2, window_bounds = array<i64: 4>}, {transform_indices = @transform_3, window_bounds = array<i64: 1, 256>}]} {
    %c0 = arith.constant 0 : index
    %0 = memref.load %arg3[%c0] : memref<4xf32, #tpu.memory_space<smem>>
    %c1 = arith.constant 1 : index
    %1 = memref.load %arg3[%c1] : memref<4xf32, #tpu.memory_space<smem>>
    %c0_0 = arith.constant 0 : index
    %c0_1 = arith.constant 0 : index
    %2 = vector.load %arg1[%c0_0, %c0_1] : memref<8x256xf32, #tpu.memory_space<vmem>>, vector<8x256xf32>
    %c0_2 = arith.constant 0 : index
    %c0_3 = arith.constant 0 : index
    %3 = vector.load %arg2[%c0_2, %c0_3] : memref<8x1xf32, #tpu.memory_space<vmem>>, vector<8x1xf32>
    %4 = vector.broadcast %3 : vector<8x1xf32> to vector<8x256xf32>
    %5 = arith.mulf %2, %4 : vector<8x256xf32>
    %cst = arith.constant dense<0.000000e+00> : vector<256xf32>
    %6 = vector.multi_reduction <add>, %5, %cst [0] : vector<8x256xf32> to vector<256xf32>
    %7 = vector.shape_cast %6 : vector<256xf32> to vector<1x256xf32>
    %8 = vector.broadcast %0 : f32 to vector<1x256xf32>
    %9 = arith.subf %7, %8 : vector<1x256xf32>
    %10 = arith.mulf %9, %9 : vector<1x256xf32>
    %11 = vector.broadcast %1 : f32 to vector<1x256xf32>
    %12 = arith.addf %10, %11 : vector<1x256xf32>
    %13 = tpu.reciprocal %12 {approx = true} : vector<1x256xf32> -> vector<1x256xf32>
    %14 = vector.broadcast %1 : f32 to vector<1x256xf32>
    %15 = arith.mulf %14, %13 : vector<1x256xf32>
    %c0_4 = arith.constant 0 : index
    %c0_5 = arith.constant 0 : index
    %16 = vector.load %arg4[%c0_4, %c0_5] : memref<1x256xf32, #tpu.memory_space<vmem>>, vector<1x256xf32>
    tpu.vector_store %arg4[%c0_4, %c0_5], %15 {strides = array<i32>} : memref<1x256xf32, #tpu.memory_space<vmem>>, vector<1x256xf32>,
    return
  }
  func.func @transform_0(%arg0: i32) -> (i32, i32) {
    %c0_i32 = arith.constant 0 : i32
    %c0_i32_0 = arith.constant 0 : i32
    return %c0_i32, %arg0 : i32, i32
  }
  func.func @transform_1(%arg0: i32) -> (i32, i32) {
    %c0_i32 = arith.constant 0 : i32
    %c0_i32_0 = arith.constant 0 : i32
    %c0_i32_1 = arith.constant 0 : i32
    return %c0_i32, %c0_i32_0 : i32, i32
  }
  func.func @transform_2(%arg0: i32) -> i32 {
    %c0_i32 = arith.constant 0 : i32
    %c0_i32_0 = arith.constant 0 : i32
    return %c0_i32 : i32
  }
  func.func @transform_3(%arg0: i32) -> (i32, i32) {
    %c0_i32 = arith.constant 0 : i32
    %c0_i32_0 = arith.constant 0 : i32
    return %c0_i32, %arg0 : i32, i32
  }
}

</mosaic_0001>

<bundles_post_ra>
// kernel: tpu_custom_call.1
= control target key start
LH: loop header
LB: loop body
LE: loop exit
PB: predicated region body
PF: predicated region fallthrough
CT: control target
= control target key end

     0   :  { %8 = vsyncpa [#allocation3], 0  ;;  %s221_s0 = inlined_call_operand.hbm [shape: f32[8,256], index: 0, kind: input, shape index: {}]   ;;  %s222_s1 = inlined_call_operand.vmem [shape: f32[8,1], index: 1, kind: input, shape index: {}]   ;;  %s223_s2 = inlined_call_operand.vmem [shape: f32[4], index: 2, kind: input, shape index: {}]   ;;  %s224_s3 = inlined_call_operand.hbm [shape: f32[1,256], index: 3, kind: output, shape index: {}]  }
   0x1   :  { %9 = vsyncpa [#allocation5], 0 }
   0x2   :  { %10 = vsyncpa [#allocation4], 0  ;;  %s29_s14 = sshll.u32 %s223_s2, 4  ;;  %s184_s15 = smov [#allocation2]   ;;  %s30_s14 = int_to_ptr.vmem [resolvable:$true] %s29_s14 }
   0x3   :  { %s17_s16 = sshll.u32 %s184_s15, 4  ;;  %s18_s16 = int_to_ptr.vmem [resolvable:$true] %s17_s16 }
   0x4   :  { %s134_s17 = scalar_lea.vmem %s18_s16, 256  ;;  %p139_p1 = scmp.lt.s32.totalorder %s18_s16, %s18_s16 }
   0x5   :  { %p135_p0 = scmp.ne.s32.totalorder %s18_s16, %s134_s17  ;;  %p140_p2 = scmp.lt.s32.totalorder %s134_s17, %s134_s17 }
   0x7   :  { %p141_p3 = por %p140_p2, %p139_p1 }
   0x9   :  { %p142_p4 = pnand %p141_p3, %p135_p0 }
   0xb   :  { %145 = shalt.err (!%p142_p4)
}
   0xc   :  { %20 = dma.hbm_to_vmem [thread:$0]  %s221_s0, 256, %s18_s16, [#allocation3]  }
   0xd   :  { %s146_s20 = scalar_lea.vmem %s30_s14, 16  ;;  %p151_p6 = scmp.lt.s32.totalorder %s30_s14, %s30_s14 }
   0xe   :  { %p147_p5 = scmp.ne.s32.totalorder %s30_s14, %s146_s20  ;;  %p152_p7 = scmp.lt.s32.totalorder %s146_s20, %s146_s20 }
  0x10   :  { %p153_p8 = por %p152_p7, %p151_p6 }
  0x12   :  { %p154_p9 = pnand %p153_p8, %p147_p5 }
  0x14   :  { %157 = shalt.err (!%p154_p9)
}
  0x15   :  { %s185_s2 = smov [#allocation6]  }
  0x16   :  { %32 = dma.vmem_to_smem %s30_s14, 16, %s185_s2, [#allocation5]  }
  0x17   :  { %178 = dma.done.wait [#allocation3], 256  }
  0x18   :  { %179 = vsyncadd [#allocation3], 4294967040 }
  0x19   :  { %180 = dma.done.wait [#allocation5], 16  }
  0x1a   :  { %181 = vsyncadd [#allocation5], 4294967280 }
  0x1b   :  { %39 = sfence }
  0x1c   :  { %v44_v0 = vld [vmem:[%s222_s1] sm:$0xff]  ;;  %v186_v1 = vmov 0   ;;  %v43_v3 = vld [vmem:[#allocation2 + $0x8] sm:$0xff]  ;;  %s40_s0 = sld [smem:[#allocation6]]  ;;  %v187_v27 = vmov 1966171168   ;;  %v82_v29 = vlaneseq }
  0x1d   :  { %121 = vset.pattern.permute.xlu0 %v186_v1  ;;  %v42_v2 = vld [vmem:[#allocation2] sm:$0xff]  ;;  %s115_s23 = sld [smem:[#allocation6 + $0x1]]  ;;  %v80_v28 = vunpack.c.l.s4 %v187_v27  ;;  %s188_s1 = smov [#allocation7]  }
  0x1e   :  { %47 = vperm.xlu0 %121, %v44_v0   ;;  %v83_v31 = vshrl.u32 %v82_v29, 7  ;;  %s105_s24 = sshll.u32 %s188_s1, 4  ;;  %vm96_vm0 = vcmp.lt.s32.totalorder %v82_v29, 256  ;;  %s106_s24 = int_to_ptr.vmem [resolvable:$true] %s105_s24 }
  0x1f   :  { %v81_v30 = vunpack.c.0.s8 %v80_v28  ;;  %s158_s25 = scalar_lea.vmem %s106_s24, 32  ;;  %p163_p11 = scmp.lt.s32.totalorder %s106_s24, %s106_s24 }
  0x20   :  { %p159_p10 = scmp.ne.s32.totalorder %s106_s24, %s158_s25  ;;  %p164_p12 = scmp.lt.s32.totalorder %s158_s25, %s158_s25 }
  0x21   :  { %v84_v36 = vsub.s32 %v81_v30, %v83_v31 }
  0x22   :  { %v64_v17 = vstv %s40_s0  ;;  %p165_p13 = por %p164_p12, %p163_p11 }
  0x23   :  { %v69_v22 = vstv %s115_s23 }
  0x24   :  { %p166_p0 = pnand %p165_p13, %p159_p10 }
  0x99   :  { %v48_v4 = vpop.permute.xlu0 %47 }
  0x9a   :  { %v50_v5 = vmul.f32 %v48_v4, %v42_v2  ;;  %v51_v6 = vmul.f32 %v48_v4, %v43_v3 }
  0x9c   :  { %v52_v7 = vrot.slane %v50_v5, 4  ;;  %v58_v8 = vrot.slane %v51_v6, 4 }
  0x9e   :  { %v53_v9 = vadd.f32 %v52_v7, %v50_v5  ;;  %v59_v10 = vadd.f32 %v58_v8, %v51_v6 }
  0xa0   :  { %v54_v11 = vrot.slane %v53_v9, 2  ;;  %v60_v12 = vrot.slane %v59_v10, 2 }
  0xa2   :  { %v55_v13 = vadd.f32 %v54_v11, %v53_v9  ;;  %v61_v14 = vadd.f32 %v60_v12, %v59_v10 }
  0xa4   :  { %v56_v15 = vrot.slane %v55_v13, 1  ;;  %v62_v16 = vrot.slane %v61_v14, 1 }
  0xa6   :  { %v57_v18 = vadd.f32 %v56_v15, %v55_v13  ;;  %v63_v19 = vadd.f32 %v62_v16, %v61_v14 }
  0xa8   :  { %v65_v20 = vsub.f32 %v57_v18, %v64_v17  ;;  %v66_v21 = vsub.f32 %v63_v19, %v64_v17 }
  0xaa   :  { %v67_v23 = vmul.f32 %v65_v20, %v65_v20  ;;  %v68_v24 = vmul.f32 %v66_v21, %v66_v21 }
  0xac   :  { %v70_v25 = vadd.f32 %v69_v22, %v67_v23  ;;  %v71_v26 = vadd.f32 %v69_v22, %v68_v24 }
  0xae   :  { %122 = vrcp.f32 %v70_v25 }
  0xaf   :  { %124 = vrcp.f32 %v71_v26 }
  0xbb   :  { %v123_v32 = vpop.eup %122 }
  0xbc   :  { %v125_v33 = vpop.eup %124  ;;  %v74_v34 = vmul.f32 %v123_v32, %v69_v22 }
  0xbd   :  { %v75_v35 = vmul.f32 %v125_v33, %v69_v22 }
  0xbf   :  { %v78_v37 = vcombine.low %v74_v34, %v75_v35 }
  0xc1   :  { %v85_v38 = vrot.slane %v78_v37, %v84_v36 }
  0xc3   :  { %v92_v39 = vrot.slane %v85_v38, %v84_v36 }
  0xc5   :  { %98 = vst.msk [vmem:[#allocation7] sm:$0x3] %vm96_vm0, %v92_v39 }
  0xc6   :  { %169 = shalt.err (!%p166_p0)
}
  0xc7   :  { %108 = dma.vmem_to_hbm [thread:$0]  %s106_s24, 32, %s224_s3, [#allocation4]  }
  0xc8   :  { %182 = dma.done.wait [#allocation4], 32  }
  0xc9   :  { %183 = vsyncadd [#allocation4], 4294967264 }
  0xca   :  { %112 = vsyncpa [#allocation3], 1 }
  0xcb   :  { %113 = vsyncpa [#allocation4], 1 }
  0xcc   :  { %114 = vsyncpa [#allocation5], 1 }

</bundles_post_ra>
